<compile_context>
chip_gen: v7x
topology: tpu7x:2x2x1
jax: 0.10.0
libtpu: 0.0.40
codegen_flags: <defaults>
</compile_context>

<pallas_src>
import functools

import jax
import jax.numpy as jnp
from jax.experimental import pallas as pl
from jax.experimental.pallas import tpu as pltpu


def _round_up(x, m):
    return (x + m - 1) // m * m


def _tagger2_kernel(tokens_ref, ew1_ref, b1_ref, w2_ref, b2_ref, o_ref):
    """One batch tile of the fused Tagger2 forward.

    tokens_ref : (TB, window) int32   token ids pre-offset by w*vocab_pad
    ew1_ref    : (window*vocab_pad, hidden_pad) compute dtype  (E @ W1, stacked)
    b1_ref     : (1, hidden_pad) f32  (pad cols 0)
    w2_ref     : (hidden_pad, out_pad) compute dtype (pad rows/cols 0)
    b2_ref     : (1, out_pad) f32     pad cols = -1e30 so exp(pad) == 0
    o_ref      : (TB, out_dim) f32    log-probabilities (real classes only)
    """
    tb, window = tokens_ref.shape
    k = ew1_ref.shape[0]                       # window * vocab_pad
    compute_dtype = ew1_ref.dtype
    out_dim = o_ref.shape[1]

    # One-hot over the flattened (window, vocab_pad) axis.  Token ids are
    # already offset by w*vocab_pad, so each compare hits exactly one segment.
    col = jax.lax.broadcasted_iota(jnp.int32, (tb, k), 1)
    hit = col == tokens_ref[:, 0:1]
    for w in range(1, window):                 # window is small; static unroll
        hit = hit | (col == tokens_ref[:, w:w + 1])
    onehot = hit.astype(compute_dtype)         # exact in bf16 (0/1)

    # Fused embedding gather + flatten + fc1: one long-K MXU matmul.
    pre = jnp.dot(onehot, ew1_ref[...],
                  preferred_element_type=jnp.float32) + b1_ref[...]
    h = jnp.tanh(pre)                          # f32 VPU/EUP path

    logits = jnp.dot(h.astype(compute_dtype), w2_ref[...],
                     preferred_element_type=jnp.float32) + b2_ref[...]

    # log_softmax over classes; padded class columns have logit -1e30 so
    # exp(pad) == 0 and the normalization over the real classes is exact.
    m = jnp.max(logits, axis=-1, keepdims=True)
    shifted = logits - m
    lse = jnp.log(jnp.sum(jnp.exp(shifted), axis=-1, keepdims=True))
    logp = shifted - lse

    # Compact writeback: only the real class columns leave the kernel.
    o_ref[...] = logp[:, :out_dim].astype(o_ref.dtype)


@functools.partial(jax.jit, static_argnames=("block_b", "use_bf16"))
def tagger2_forward(tokens, emb_table, w1, b1, w2, b2, *, block_b=256, use_bf16=True):
    """tokens: (B, window) int; returns (B, output_dim) f32 log-probabilities.

    w1: (window*emb_dim, hidden), b1: (1, hidden) or (hidden,)
    w2: (hidden, output_dim),     b2: (1, output_dim) or (output_dim,)
    (nn.Linear weights pre-transposed to (in, out).)
    """
    B, window = tokens.shape
    vocab, emb_dim = emb_table.shape
    hidden = w1.shape[1]
    out_dim = w2.shape[1]
    assert w1.shape[0] == window * emb_dim

    compute_dtype = jnp.bfloat16 if use_bf16 else jnp.float32

    # Lane-dense padding of the small feature dims.
    vocab_pad = _round_up(vocab, 128)
    hidden_pad = _round_up(hidden, 128)
    out_pad = _round_up(out_dim, 128)

    # Fold the embedding table into fc1: EW1[w] = E @ W1[w]  (computed in f32,
    # then cast once to the MXU operand dtype).  Rows >= vocab are zero, so an
    # out-of-range-but-<vocab_pad id yields a zero embedding contribution.
    emb_f32 = emb_table.astype(jnp.float32)
    w1_3d = w1.reshape(window, emb_dim, hidden).astype(jnp.float32)
    ew1 = jnp.einsum("ve,weh->wvh", emb_f32, w1_3d)        # (window, vocab, hidden)
    ew1_p = jnp.zeros((window, vocab_pad, hidden_pad), jnp.float32)
    ew1_p = ew1_p.at[:, :vocab, :hidden].set(ew1)
    ew1_p = ew1_p.reshape(window * vocab_pad, hidden_pad).astype(compute_dtype)

    b1_p = jnp.zeros((1, hidden_pad), jnp.float32)
    b1_p = b1_p.at[:, :hidden].set(b1.reshape(1, hidden).astype(jnp.float32))

    w2_p = jnp.zeros((hidden_pad, out_pad), compute_dtype)
    w2_p = w2_p.at[:hidden, :out_dim].set(w2.astype(compute_dtype))

    # Keep b2 padding in f32 (-1e30 is not representable in bf16).
    b2_p = jnp.full((1, out_pad), -1e30, jnp.float32)
    b2_p = b2_p.at[:, :out_dim].set(b2.reshape(1, out_dim).astype(jnp.float32))

    # Batch tiling: TB multiple of 8 (f32 sublane), capped at block_b, and when
    # B > 8 additionally capped so grid[0] >= 2 (both v7x TensorCores get work).
    tb = min(_round_up(B, 8), _round_up(block_b, 8))
    if B > 8:
        tb = min(tb, _round_up((B + 1) // 2, 8))
    tb = max(tb, 8)
    b_pad = _round_up(B, tb)

    # Pre-offset token ids by w*vocab_pad so the kernel's one-hot is one compare
    # per window position against a single flat iota.
    offs = (jnp.arange(window, dtype=jnp.int32) * vocab_pad)[None, :]
    tokens_off = tokens.astype(jnp.int32) + offs
    if b_pad == B:
        tokens_p = tokens_off                      # skip the pad copy when aligned
    else:
        tokens_p = jnp.zeros((b_pad, window), jnp.int32).at[:B].set(tokens_off)

    grid = (b_pad // tb,)

    itemsize = jnp.dtype(compute_dtype).itemsize
    flops = 2 * b_pad * (window * vocab_pad * hidden_pad + hidden_pad * out_pad)
    transcendentals = b_pad * (hidden_pad + out_pad)
    bytes_accessed = (b_pad * window * 4                       # tokens in
                      + b_pad * out_dim * 4                    # log-probs out
                      + (window * vocab_pad * hidden_pad
                         + hidden_pad * out_pad) * itemsize    # weights
                      + (hidden_pad + out_pad) * 4)            # biases

    out = pl.pallas_call(
        _tagger2_kernel,
        out_shape=jax.ShapeDtypeStruct((b_pad, out_dim), jnp.float32),
        grid_spec=pltpu.PrefetchScalarGridSpec(
            num_scalar_prefetch=0,
            grid=grid,
            in_specs=[
                # Batch-tiled (pre-offset) token ids.
                pl.BlockSpec((tb, window), lambda i: (i, 0)),
                # Weights/biases: constant index_map -> VMEM-resident across grid.
                pl.BlockSpec((window * vocab_pad, hidden_pad), lambda i: (0, 0)),
                pl.BlockSpec((1, hidden_pad), lambda i: (0, 0)),
                pl.BlockSpec((hidden_pad, out_pad), lambda i: (0, 0)),
                pl.BlockSpec((1, out_pad), lambda i: (0, 0)),
            ],
            out_specs=pl.BlockSpec((tb, out_dim), lambda i: (i, 0)),
        ),
        compiler_params=pltpu.CompilerParams(
            dimension_semantics=("parallel",)),
        cost_estimate=pl.CostEstimate(
            flops=flops,
            transcendentals=transcendentals,
            bytes_accessed=bytes_accessed),
    )(tokens_p, ew1_p, b1_p, w2_p, b2_p)

    return out[:B]


def _reference(tokens, emb_table, w1, b1, w2, b2):
    x = emb_table[tokens].reshape(tokens.shape[0], -1)
    logits = jnp.tanh(x @ w1 + b1.reshape(1, -1)) @ w2 + b2.reshape(1, -1)
    return jax.nn.log_softmax(logits, axis=1)


if __name__ == "__main__":
    # Small, deterministic configuration consistent with the module's __init__.
    vocab_size = 100
    embedding_dim = 50
    window_size = 5
    hidden_dim = 32
    output_dim = 16
    batch = 8

    key = jax.random.PRNGKey(0)
    k_emb, k_w1, k_b1, k_w2, k_b2, k_tok, k_tok2 = jax.random.split(key, 7)

    emb_table = jax.random.normal(k_emb, (vocab_size, embedding_dim), jnp.float32) * 0.1
    # nn.Linear stores weight as (out, in); pre-transposed here to (in, out).
    w1 = jax.random.normal(
        k_w1, (embedding_dim * window_size, hidden_dim), jnp.float32) * 0.05
    b1 = jax.random.normal(k_b1, (1, hidden_dim), jnp.float32) * 0.05
    w2 = jax.random.normal(k_w2, (hidden_dim, output_dim), jnp.float32) * 0.05
    b2 = jax.random.normal(k_b2, (1, output_dim), jnp.float32) * 0.05

    tokens = jax.random.randint(k_tok, (batch, window_size), 0, vocab_size, jnp.int32)
    ref = _reference(tokens, emb_table, w1, b1, w2, b2)

    # Default path: bf16 MXU operands, f32 accumulation / tanh / log-softmax.
    out = tagger2_forward(tokens, emb_table, w1, b1, w2, b2)
    out = jax.block_until_ready(out)
    assert out.shape == (batch, output_dim)
    assert jnp.allclose(out, ref, atol=5e-2, rtol=5e-2), \
        float(jnp.max(jnp.abs(out - ref)))

    # f32 MXU path: verifies the fold-E-into-W1 restructure is mathematically exact.
    out_f32 = tagger2_forward(tokens, emb_table, w1, b1, w2, b2, use_bf16=False)
    out_f32 = jax.block_until_ready(out_f32)
    assert jnp.allclose(out_f32, ref, atol=1e-4, rtol=1e-4), \
        float(jnp.max(jnp.abs(out_f32 - ref)))

    # Larger, non-tile-aligned batch: exercises multi-step grid + batch padding.
    batch2 = 300
    tokens2 = jax.random.randint(k_tok2, (batch2, window_size), 0, vocab_size, jnp.int32)
    ref2 = _reference(tokens2, emb_table, w1, b1, w2, b2)
    out2 = tagger2_forward(tokens2, emb_table, w1, b1, w2, b2, block_b=128)
    out2 = jax.block_until_ready(out2)
    assert out2.shape == (batch2, output_dim)
    assert jnp.allclose(out2, ref2, atol=5e-2, rtol=5e-2), \
        float(jnp.max(jnp.abs(out2 - ref2)))

    print("KERNEL_OK")
</pallas_src>

<mosaic_0001>
module attributes {stable_mosaic.version = 11 : i64} {
  func.func @_tagger2_kernel(%arg0: i32, %arg1: memref<8x5xi32, #tpu.memory_space<vmem>>, %arg2: memref<640x128xbf16, #tpu.memory_space<vmem>>, %arg3: memref<1x128xf32, #tpu.memory_space<vmem>>, %arg4: memref<128x128xbf16, #tpu.memory_space<vmem>>, %arg5: memref<1x128xf32, #tpu.memory_space<vmem>>, %arg6: memref<8x16xf32, #tpu.memory_space<vmem>>) attributes {dimension_semantics = [#tpu.dimension_semantics<parallel>], iteration_bounds = array<i64: 1>, scalar_prefetch = 0 : i64, scratch_operands = 0 : i64, tpu.core_type = #tpu.core_type<tc>, window_params = [{transform_indices = @transform_0, window_bounds = array<i64: 8, 5>}, {pipeline_mode = #tpu.pipeline_mode<synchronous>, transform_indices = @transform_1, window_bounds = array<i64: 640, 128>}, {pipeline_mode = #tpu.pipeline_mode<synchronous>, transform_indices = @transform_2, window_bounds = array<i64: 1, 128>}, {pipeline_mode = #tpu.pipeline_mode<synchronous>, transform_indices = @transform_3, window_bounds = array<i64: 128, 128>}, {pipeline_mode = #tpu.pipeline_mode<synchronous>, transform_indices = @transform_4, window_bounds = array<i64: 1, 128>}, {transform_indices = @transform_5, window_bounds = array<i64: 8, 16>}]} {
    %0 = tpu.iota {dimensions = array<i32: 1>} : vector<8x640xi32>
    %c0 = arith.constant 0 : index
    %c0_0 = arith.constant 0 : index
    %1 = vector.load %arg1[%c0, %c0_0] : memref<8x5xi32, #tpu.memory_space<vmem>>, vector<8x1xi32>
    %2 = vector.broadcast %1 : vector<8x1xi32> to vector<8x640xi32>
    %3 = arith.cmpi eq, %0, %2 : vector<8x640xi32>
    %c0_1 = arith.constant 0 : index
    %c1 = arith.constant 1 : index
    %4 = vector.load %arg1[%c0_1, %c1] : memref<8x5xi32, #tpu.memory_space<vmem>>, vector<8x1xi32>
    %5 = vector.broadcast %4 : vector<8x1xi32> to vector<8x640xi32>
    %6 = arith.cmpi eq, %0, %5 : vector<8x640xi32>
    %7 = arith.ori %3, %6 : vector<8x640xi1>
    %c0_2 = arith.constant 0 : index
    %c2 = arith.constant 2 : index
    %8 = vector.load %arg1[%c0_2, %c2] : memref<8x5xi32, #tpu.memory_space<vmem>>, vector<8x1xi32>
    %9 = vector.broadcast %8 : vector<8x1xi32> to vector<8x640xi32>
    %10 = arith.cmpi eq, %0, %9 : vector<8x640xi32>
    %11 = arith.ori %7, %10 : vector<8x640xi1>
    %c0_3 = arith.constant 0 : index
    %c3 = arith.constant 3 : index
    %12 = vector.load %arg1[%c0_3, %c3] : memref<8x5xi32, #tpu.memory_space<vmem>>, vector<8x1xi32>
    %13 = vector.broadcast %12 : vector<8x1xi32> to vector<8x640xi32>
    %14 = arith.cmpi eq, %0, %13 : vector<8x640xi32>
    %15 = arith.ori %11, %14 : vector<8x640xi1>
    %c0_4 = arith.constant 0 : index
    %c4 = arith.constant 4 : index
    %16 = vector.load %arg1[%c0_4, %c4] : memref<8x5xi32, #tpu.memory_space<vmem>>, vector<8x1xi32>
    %17 = vector.broadcast %16 : vector<8x1xi32> to vector<8x640xi32>
    %18 = arith.cmpi eq, %0, %17 : vector<8x640xi32>
    %19 = arith.ori %15, %18 : vector<8x640xi1>
    %20 = arith.extui %19 : vector<8x640xi1> to vector<8x640xi32>
    %21 = arith.sitofp %20 : vector<8x640xi32> to vector<8x640xf32>
    %22 = arith.truncf %21 : vector<8x640xf32> to vector<8x640xbf16>
    %c0_5 = arith.constant 0 : index
    %c0_6 = arith.constant 0 : index
    %23 = vector.load %arg2[%c0_5, %c0_6] : memref<640x128xbf16, #tpu.memory_space<vmem>>, vector<640x128xbf16>
    %cst = arith.constant dense<0.000000e+00> : vector<8x128xf32>
    %24 = tpu.matmul %22, %23, %cst {dimension_numbers = #tpu.dot_dimension_numbers<[1], [0], [0], [1], [0, 0, 1, 1], [], []>} : vector<8x640xbf16>, vector<640x128xbf16>, vector<8x128xf32> -> vector<8x128xf32>
    %c0_7 = arith.constant 0 : index
    %c0_8 = arith.constant 0 : index
    %25 = vector.load %arg3[%c0_7, %c0_8] : memref<1x128xf32, #tpu.memory_space<vmem>>, vector<1x128xf32>
    %26 = vector.broadcast %25 : vector<1x128xf32> to vector<8x128xf32>
    %27 = arith.addf %24, %26 : vector<8x128xf32>
    %28 = math.tanh %27 : vector<8x128xf32>
    %29 = arith.truncf %28 : vector<8x128xf32> to vector<8x128xbf16>
    %c0_9 = arith.constant 0 : index
    %c0_10 = arith.constant 0 : index
    %30 = vector.load %arg4[%c0_9, %c0_10] : memref<128x128xbf16, #tpu.memory_space<vmem>>, vector<128x128xbf16>
    %cst_11 = arith.constant dense<0.000000e+00> : vector<8x128xf32>
    %31 = tpu.matmul %29, %30, %cst_11 {dimension_numbers = #tpu.dot_dimension_numbers<[1], [0], [0], [1], [0, 0, 1, 1], [], []>} : vector<8x128xbf16>, vector<128x128xbf16>, vector<8x128xf32> -> vector<8x128xf32>
    %c0_12 = arith.constant 0 : index
    %c0_13 = arith.constant 0 : index
    %32 = vector.load %arg5[%c0_12, %c0_13] : memref<1x128xf32, #tpu.memory_space<vmem>>, vector<1x128xf32>
    %33 = vector.broadcast %32 : vector<1x128xf32> to vector<8x128xf32>
    %34 = arith.addf %31, %33 : vector<8x128xf32>
    %cst_14 = arith.constant dense<0xFF800000> : vector<8xf32>
    %35 = vector.multi_reduction <maximumf>, %34, %cst_14 [1] : vector<8x128xf32> to vector<8xf32>
    %36 = vector.shape_cast %35 : vector<8xf32> to vector<8x1xf32>
    %37 = vector.broadcast %36 : vector<8x1xf32> to vector<8x128xf32>
    %38 = arith.subf %34, %37 : vector<8x128xf32>
    %39 = math.exp %38 : vector<8x128xf32>
    %cst_15 = arith.constant dense<0.000000e+00> : vector<8xf32>
    %40 = vector.multi_reduction <add>, %39, %cst_15 [1] : vector<8x128xf32> to vector<8xf32>
    %41 = vector.shape_cast %40 : vector<8xf32> to vector<8x1xf32>
    %42 = math.log %41 : vector<8x1xf32>
    %43 = vector.broadcast %42 : vector<8x1xf32> to vector<8x128xf32>
    %44 = arith.subf %38, %43 : vector<8x128xf32>
    %45 = vector.extract_strided_slice %44 {offsets = [0, 0], sizes = [8, 16], strides = [1, 1]} : vector<8x128xf32> to vector<8x16xf32>
    %c0_16 = arith.constant 0 : index
    %c0_17 = arith.constant 0 : index
    %46 = vector.load %arg6[%c0_16, %c0_17] : memref<8x16xf32, #tpu.memory_space<vmem>>, vector<8x16xf32>
    tpu.vector_store %arg6[%c0_16, %c0_17], %45 {strides = array<i32>} : memref<8x16xf32, #tpu.memory_space<vmem>>, vector<8x16xf32>,
    return
  }
  func.func @transform_0(%arg0: i32) -> (i32, i32) {
    %c0_i32 = arith.constant 0 : i32
    %c0_i32_0 = arith.constant 0 : i32
    return %arg0, %c0_i32 : i32, i32
  }
  func.func @transform_1(%arg0: i32) -> (i32, i32) {
    %c0_i32 = arith.constant 0 : i32
    %c0_i32_0 = arith.constant 0 : i32
    %c0_i32_1 = arith.constant 0 : i32
    return %c0_i32, %c0_i32_0 : i32, i32
  }
  func.func @transform_2(%arg0: i32) -> (i32, i32) {
    %c0_i32 = arith.constant 0 : i32
    %c0_i32_0 = arith.constant 0 : i32
    %c0_i32_1 = arith.constant 0 : i32
    return %c0_i32, %c0_i32_0 : i32, i32
  }
  func.func @transform_3(%arg0: i32) -> (i32, i32) {
    %c0_i32 = arith.constant 0 : i32
    %c0_i32_0 = arith.constant 0 : i32
    %c0_i32_1 = arith.constant 0 : i32
    return %c0_i32, %c0_i32_0 : i32, i32
  }
  func.func @transform_4(%arg0: i32) -> (i32, i32) {
    %c0_i32 = arith.constant 0 : i32
    %c0_i32_0 = arith.constant 0 : i32
    %c0_i32_1 = arith.constant 0 : i32
    return %c0_i32, %c0_i32_0 : i32, i32
  }
  func.func @transform_5(%arg0: i32) -> (i32, i32) {
    %c0_i32 = arith.constant 0 : i32
    %c0_i32_0 = arith.constant 0 : i32
    return %arg0, %c0_i32 : i32, i32
  }
}

</mosaic_0001>

<bundles_post_ra>
// kernel: tagger2_forward.1
= control target key start
LH: loop header
LB: loop body
LE: loop exit
PB: predicated region body
PF: predicated region fallthrough
CT: control target
= control target key end

     0   :  { %v939_v2 = vmov 2   ;;  %v940_v3 = vmov 0   ;;  %v941_v8 = vmov 3   ;;  %v942_v9 = vmov 1   ;;  %s1211_s0 = inlined_call_operand.vmem [shape: s32[8,5], index: 0, kind: input, shape index: {}]   ;;  %s1212_s1 = inlined_call_operand.vmem [shape: bf16[640,128], index: 1, kind: input, shape index: {}]   ;;  %s1213_s2 = inlined_call_operand.vmem [shape: f32[1,128], index: 2, kind: input, shape index: {}]   ;;  %s1214_s3 = inlined_call_operand.vmem [shape: bf16[128,128], index: 3, kind: input, shape index: {}]   ;;  %s1215_s4 = inlined_call_operand.vmem [shape: f32[1,128], index: 4, kind: input, shape index: {}]   ;;  %s1216_s5 = inlined_call_operand.hbm [shape: f32[8,16], index: 5, kind: output, shape index: {}]  }
   0x1   :  { %v28_v0 = vld [vmem:[%s1211_s0] sm:$0xff]  ;;  %857 = vset.pattern.permute.xlu1 %v939_v2  ;;  %855 = vset.pattern.permute.xlu0 %v940_v3  ;;  %v865_v7 = vld [vmem:[%s1212_s1 + $0x48] sm:$0xff]   ;;  %v869_v13 = vld [vmem:[%s1212_s1 + $0x50] sm:$0xff]   ;;  %v943_v15 = vmov 4   ;;  %v944_v38 = vmov 0.0  }
   0x2   :  { %v861_v1 = vld [vmem:[%s1212_s1 + $0x40] sm:$0xff]   ;;  %51 = vperm.xlu1 %857, %v28_v0   ;;  %30 = vperm.xlu0 %855, %v28_v0   ;;  %v866_v10 = vld [vmem:[%s1212_s1 + $0x8] sm:$0xff]   ;;  %v870_v14 = vld [vmem:[%s1212_s1 + $0x10] sm:$0xff]  }
   0x3   :  { %v862_v4 = vld [vmem:[%s1212_s1] sm:$0xff]   ;;  %745 = vmatprep.subr.bf16.mxu0 %v861_v1  ;;  %v867_v11 = vld [vmem:[%s1212_s1 + $0xc8] sm:$0xff]   ;;  %v871_v16 = vld [vmem:[%s1212_s1 + $0xd0] sm:$0xff]  }
   0x4   :  { %v863_v5 = vld [vmem:[%s1212_s1 + $0xc0] sm:$0xff]   ;;  %746 = vmatpush3.bf16.msra.mxu0 %v862_v4  ;;  %v868_v12 = vld [vmem:[%s1212_s1 + $0x88] sm:$0xff]   ;;  %v872_v17 = vld [vmem:[%s1212_s1 + $0x90] sm:$0xff]  }
   0x5   :  { %v864_v6 = vld [vmem:[%s1212_s1 + $0x80] sm:$0xff]   ;;  %767 = vmatprep.subr.bf16.mxu1 %v863_v5  ;;  %747 = vmatprep.subr.bf16.mxu0 %v865_v7  ;;  %v873_v18 = vld [vmem:[%s1212_s1 + $0x58] sm:$0xff]   ;;  %v881_v26 = vld [vmem:[%s1212_s1 + $0x68] sm:$0xff]  }
   0x6   :  { %858 = vset.pattern.permute.xlu1 %v941_v8  ;;  %856 = vset.pattern.permute.xlu0 %v942_v9  ;;  %v874_v19 = vld [vmem:[%s1212_s1 + $0x18] sm:$0xff]   ;;  %v877_v22 = vld [vmem:[%s1212_s1 + $0x60] sm:$0xff]   ;;  %v882_v27 = vld [vmem:[%s1212_s1 + $0x28] sm:$0xff]  }
   0x7   :  { %64 = vperm.xlu1 %858, %v28_v0   ;;  %38 = vperm.xlu0 %856, %v28_v0   ;;  %v875_v20 = vld [vmem:[%s1212_s1 + $0xd8] sm:$0xff]   ;;  %v878_v23 = vld [vmem:[%s1212_s1 + $0x20] sm:$0xff]   ;;  %v883_v28 = vld [vmem:[%s1212_s1 + $0xe8] sm:$0xff]  }
   0x8   :  { %768 = vmatpush3.bf16.msra.mxu1 %v864_v6  ;;  %748 = vmatpush3.bf16.msra.mxu0 %v866_v10  ;;  %v876_v21 = vld [vmem:[%s1212_s1 + $0x98] sm:$0xff]   ;;  %v879_v24 = vld [vmem:[%s1212_s1 + $0xe0] sm:$0xff]   ;;  %v884_v29 = vld [vmem:[%s1212_s1 + $0xa8] sm:$0xff]  }
   0x9   :  { %769 = vmatprep.subr.bf16.mxu1 %v867_v11  ;;  %749 = vmatprep.subr.bf16.mxu0 %v869_v13  ;;  %v880_v25 = vld [vmem:[%s1212_s1 + $0xa0] sm:$0xff]   ;;  %v885_v30 = vld [vmem:[%s1212_s1 + $0x70] sm:$0xff]   ;;  %v889_v34 = vld [vmem:[%s1212_s1 + $0x78] sm:$0xff]  }
   0xa   :  { %v886_v31 = vld [vmem:[%s1212_s1 + $0x30] sm:$0xff]   ;;  %v890_v35 = vld [vmem:[%s1212_s1 + $0x38] sm:$0xff]  }
   0xb   :  { %859 = vset.pattern.permute.xlu1 %v943_v15  ;;  %860 = vset.pattern.permute.xlu0 %v943_v15  ;;  %v887_v32 = vld [vmem:[%s1212_s1 + $0xf0] sm:$0xff]   ;;  %v891_v36 = vld [vmem:[%s1212_s1 + $0xf8] sm:$0xff]  }
   0xc   :  { %77 = vperm.xlu1 %859, %v28_v0   ;;  %770 = vmatpush3.bf16.msra.mxu1 %v868_v12  ;;  %v888_v33 = vld [vmem:[%s1212_s1 + $0xb0] sm:$0xff]   ;;  %v892_v37 = vld [vmem:[%s1212_s1 + $0xb8] sm:$0xff]  }
   0xd   :  { %750 = vmatpush3.bf16.msra.mxu0 %v870_v14  ;;  %771 = vmatprep.subr.bf16.mxu1 %v871_v16 }
   0xe   :  { %751 = vmatprep.subr.bf16.mxu0 %v873_v18 }
  0x10   :  { %772 = vmatpush3.bf16.msra.mxu1 %v872_v17 }
  0x11   :  { %752 = vmatpush3.bf16.msra.mxu0 %v874_v19  ;;  %773 = vmatprep.subr.bf16.mxu1 %v875_v20 }
  0x12   :  { %753 = vmatprep.subr.bf16.mxu0 %v877_v22 }
  0x14   :  { %774 = vmatpush3.bf16.msra.mxu1 %v876_v21 }
  0x15   :  { %754 = vmatpush3.bf16.msra.mxu0 %v878_v23  ;;  %775 = vmatprep.subr.bf16.mxu1 %v879_v24 }
  0x16   :  { %755 = vmatprep.subr.bf16.mxu0 %v881_v26 }
  0x18   :  { %776 = vmatpush3.bf16.msra.mxu1 %v880_v25 }
  0x19   :  { %756 = vmatpush3.bf16.msra.mxu0 %v882_v27  ;;  %777 = vmatprep.subr.bf16.mxu1 %v883_v28 }
  0x1a   :  { %757 = vmatprep.subr.bf16.mxu0 %v885_v30 }
  0x1c   :  { %778 = vmatpush3.bf16.msra.mxu1 %v884_v29 }
  0x1d   :  { %758 = vmatpush3.bf16.msra.mxu0 %v886_v31  ;;  %779 = vmatprep.subr.bf16.mxu1 %v887_v32 }
  0x1e   :  { %759 = vmatprep.subr.bf16.mxu0 %v889_v34 }
  0x20   :  { %780 = vmatpush3.bf16.msra.mxu1 %v888_v33 }
  0x21   :  { %760 = vmatpush3.bf16.msra.mxu0 %v890_v35  ;;  %781 = vmatprep.subr.bf16.mxu1 %v891_v36 }
  0x22   :  { %807 = vmatprep.subr.bf16.mxu0 %v944_v38 }
  0x24   :  { %782 = vmatpush3.bf16.msra.mxu1 %v892_v37 }
  0x25   :  { %827 = vmatprep.subr.bf16.mxu1 %v944_v38 }
  0x26   :  { %10 = vsyncpa [#allocation3], 0  ;;  %v22_v39 = vlaneseq  ;;  %v893_v54 = vld [vmem:[%s1212_s1 + $0x100] sm:$0xff]   ;;  %v894_v57 = vld [vmem:[%s1212_s1 + $0x108] sm:$0xff]   ;;  %s946_s13 = smov [#allocation2]  }
  0x27   :  { %v895_v59 = vld [vmem:[%s1212_s1 + $0x110] sm:$0xff]   ;;  %v896_v60 = vld [vmem:[%s1212_s1 + $0x118] sm:$0xff]   ;;  %v897_v62 = vld [vmem:[%s1212_s1 + $0x120] sm:$0xff]   ;;  %s682_s14 = sshll.u32 %s946_s13, 4  ;;  %s683_s14 = int_to_ptr.vmem [resolvable:$true] %s682_s14 }
  0x28   :  { %v1082_v42 = vand.u32 127, %v22_v39  ;;  %v898_v63 = vld [vmem:[%s1212_s1 + $0x128] sm:$0xff]   ;;  %v899_v0 = vld [vmem:[%s1212_s1 + $0x130] sm:$0xff]   ;;  %v900_v1 = vld [vmem:[%s1212_s1 + $0x138] sm:$0xff]   ;;  %p920_p1 = scmp.lt.s32.totalorder %s683_s14, %s683_s14 }
  0x29   :  { %v901_v4 = vld [vmem:[%s1214_s3] sm:$0xff]   ;;  %v902_v5 = vld [vmem:[%s1214_s3 + $0x8] sm:$0xff]   ;;  %v903_v6 = vld [vmem:[%s1214_s3 + $0x10] sm:$0xff]  }
  0x2a   :  { %v24_v45 = vadd.s32 128, %v1082_v42  ;;  %v26_v46 = vadd.s32 384, %v1082_v42  ;;  %v25_v50 = vadd.s32 256, %v1082_v42  ;;  %v27_v61 = vadd.s32 512, %v1082_v42  ;;  %v904_v7 = vld [vmem:[%s1214_s3 + $0x18] sm:$0xff]   ;;  %v905_v8 = vld [vmem:[%s1214_s3 + $0x20] sm:$0xff]  }
  0x2b   :  { %v906_v9 = vld [vmem:[%s1214_s3 + $0x28] sm:$0xff]   ;;  %v907_v10 = vld [vmem:[%s1214_s3 + $0x30] sm:$0xff]   ;;  %v908_v11 = vld [vmem:[%s1214_s3 + $0x38] sm:$0xff]  }
  0x2c   :  { %v695_v13 = vld [vmem:[%s1213_s2] ss:$0 sm:$0xff] }
  0x2d   :  { %v736_v32 = vld [vmem:[%s1215_s4] ss:$0 sm:$0xff]  ;;  %s915_s4 = scalar_lea.vmem %s683_s14, 128 }
  0x2e   :  { %p916_p0 = scmp.ne.s32.totalorder %s683_s14, %s915_s4  ;;  %p921_p2 = scmp.lt.s32.totalorder %s915_s4, %s915_s4 }
  0x30   :  { %p922_p3 = por %p921_p2, %p920_p1 }
  0x32   :  { %p923_p4 = pnand %p922_p3, %p916_p0 }
  0x81   :  { %v1078_v40 = vpop.permute.xlu1 %51  ;;  %v1080_v41 = vpop.permute.xlu0 %30 }
  0x82   :  { %vm33_vm1 = vcmp.eq.s32.totalorder %v24_v45, %v1080_v41  ;;  %vm54_vm3 = vcmp.eq.s32.totalorder %v24_v45, %v1078_v40  ;;  %vm35_vm10 = vcmp.eq.s32.totalorder %v26_v46, %v1080_v41  ;;  %vm56_vm12 = vcmp.eq.s32.totalorder %v26_v46, %v1078_v40 }
  0x86   :  { %v1084_v43 = vpop.permute.xlu1 %64  ;;  %v1086_v44 = vpop.permute.xlu0 %38 }
  0x87   :  { %vm41_vm0 = vcmp.eq.s32.totalorder %v24_v45, %v1086_v44  ;;  %vm67_vm5 = vcmp.eq.s32.totalorder %v24_v45, %v1084_v43  ;;  %vm43_vm6 = vcmp.eq.s32.totalorder %v26_v46, %v1086_v44  ;;  %vm40_vm14 = vcmp.eq.s32.totalorder %v1082_v42, %v1086_v44 }
  0x88   :  { %vm46_vm2 = vmor %vm33_vm1, %vm41_vm0  ;;  %vm69_vm0 = vcmp.eq.s32.totalorder %v26_v46, %v1084_v43 }
  0x89   :  { %vm59_vm4 = vmor %vm46_vm2, %vm54_vm3  ;;  %vm32_vm2 = vcmp.eq.s32.totalorder %v1082_v42, %v1080_v41 }
  0x8a   :  { %vm72_vm7 = vmor %vm59_vm4, %vm67_vm5  ;;  %vm53_vm5 = vcmp.eq.s32.totalorder %v1082_v42, %v1078_v40 }
  0x8b   :  { %v1093_v47 = vpop.permute.xlu1 %77  ;;  %vm48_vm11 = vmor %vm35_vm10, %vm43_vm6 }
  0x8c   :  { %vm80_vm8 = vcmp.eq.s32.totalorder %v24_v45, %v1093_v47  ;;  %vm82_vm13 = vcmp.eq.s32.totalorder %v26_v46, %v1093_v47  ;;  %vm61_vm15 = vmor %vm48_vm11, %vm56_vm12  ;;  %vm79_vm6 = vcmp.eq.s32.totalorder %v1082_v42, %v1093_v47  ;;  %vm34_vm11 = vcmp.eq.s32.totalorder %v25_v50, %v1080_v41 }
  0x8d   :  { %vm85_vm9 = vmor %vm72_vm7, %vm80_vm8  ;;  %vm42_vm7 = vcmp.eq.s32.totalorder %v25_v50, %v1086_v44 }
  0x8e   :  { %v691_v48 = vsel %vm85_vm9, 1.0, %v944_v38  ;;  %vm74_vm1 = vmor %vm61_vm15, %vm69_vm0  ;;  %vm66_vm9 = vcmp.eq.s32.totalorder %v1082_v42, %v1084_v43  ;;  %vm81_vm15 = vcmp.eq.s32.totalorder %v25_v50, %v1093_v47 }
  0x8f   :  { %v100_v49 = vpack.c.bf16 %v691_v48, %v691_v48  ;;  %vm87_vm3 = vmor %vm74_vm1, %vm82_vm13  ;;  %vm68_vm1 = vcmp.eq.s32.totalorder %v25_v50, %v1084_v43 }
  0x90   :  { %v693_v51 = vsel %vm87_vm3, 1.0, %v944_v38  ;;  %vm45_vm4 = vmor %vm32_vm2, %vm40_vm14  ;;  %vm55_vm14 = vcmp.eq.s32.totalorder %v25_v50, %v1078_v40 }
  0x91   :  { %463 = vmatprep.mubr.bf16.mxu0 %v100_v49  ;;  %v102_v52 = vpack.c.bf16 %v693_v51, %v693_v51  ;;  %vm58_vm8 = vmor %vm45_vm4, %vm53_vm5  ;;  %vm945_vm4 = vmmov 0   ;;  %vm44_vm5 = vcmp.eq.s32.totalorder %v27_v61, %v1086_v44 }
  0x92   :  { %vm71_vm10 = vmor %vm58_vm8, %vm66_vm9  ;;  %vm57_vm8 = vcmp.eq.s32.totalorder %v27_v61, %v1078_v40 }
  0x93   :  { %503 = vmatprep.mubr.bf16.mxu1 %v102_v52  ;;  %vm84_vm12 = vmor %vm71_vm10, %vm79_vm6  ;;  %vm36_vm6 = vcmp.eq.s32.totalorder %v27_v61, %v1080_v41  ;;  %vm83_vm10 = vcmp.eq.s32.totalorder %v27_v61, %v1093_v47 }
  0x94   :  { %v690_v53 = vsel %vm84_vm12, 1.0, %v944_v38  ;;  %vm47_vm13 = vmor %vm34_vm11, %vm42_vm7  ;;  %vm70_vm11 = vcmp.eq.s32.totalorder %v27_v61, %v1084_v43 }
  0x95   :  { %v99_v55 = vpack.c.bf16 %v690_v53, %v690_v53  ;;  %vm60_vm0 = vmor %vm47_vm13, %vm55_vm14  ;;  %vm674_vm14 = vcmask 130048  }
  0x96   :  { %vm73_vm2 = vmor %vm60_vm0, %vm68_vm1 }
  0x97   :  { %464 = vmatmul.mubr.bf16.vlgmr.msra.gmra.mrb[0].mxu0 %v99_v55  ;;  %vm86_vm3 = vmor %vm73_vm2, %vm81_vm15 }
  0x98   :  { %v692_v56 = vsel %vm86_vm3, 1.0, %v944_v38  ;;  %808 = vmatpush3.bf16.msra.mxu0 %v893_v54  ;;  %823 = vmatprep.mubr.msk.bf16.mxu0 %vm945_vm4, %v944_v38  ;;  %vm49_vm7 = vmor %vm36_vm6, %vm44_vm5 }
  0x99   :  { %v101_v58 = vpack.c.bf16 %v692_v56, %v692_v56  ;;  %809 = vmatprep.subr.bf16.mxu0 %v944_v38  ;;  %vm62_vm9 = vmor %vm49_vm7, %vm57_vm8 }
  0x9a   :  { %vm75_vm12 = vmor %vm62_vm9, %vm70_vm11 }
  0x9b   :  { %504 = vmatmul.mubr.bf16.vlgmr.msra.gmra.mrb[0].mxu1 %v101_v58  ;;  %vm88_vm13 = vmor %vm75_vm12, %vm83_vm10 }
  0x9c   :  { %810 = vmatpush3.bf16.msra.mxu0 %v894_v57  ;;  %843 = vmatprep.mubr.msk.bf16.mxu1 %vm945_vm4, %v944_v38  ;;  %v694_v2 = vsel %vm88_vm13, 1.0, %v944_v38 }
  0x9d   :  { %811 = vmatprep.subr.bf16.mxu0 %v944_v38  ;;  %v103_v3 = vpack.c.bf16 %v694_v2, %v694_v2  ;;  %828 = vmatpush3.bf16.msra.mxu1 %v901_v4 }
  0x9e   :  { %829 = vmatprep.subr.bf16.mxu1 %v944_v38 }
  0xa0   :  { %812 = vmatpush3.bf16.msra.mxu0 %v895_v59 }
  0xa1   :  { %813 = vmatprep.subr.bf16.mxu0 %v944_v38  ;;  %830 = vmatpush3.bf16.msra.mxu1 %v902_v5 }
  0xa2   :  { %831 = vmatprep.subr.bf16.mxu1 %v944_v38 }
  0xa4   :  { %814 = vmatpush3.bf16.msra.mxu0 %v896_v60 }
  0xa5   :  { %815 = vmatprep.subr.bf16.mxu0 %v944_v38  ;;  %832 = vmatpush3.bf16.msra.mxu1 %v903_v6 }
  0xa6   :  { %833 = vmatprep.subr.bf16.mxu1 %v944_v38 }
  0xa8   :  { %816 = vmatpush3.bf16.msra.mxu0 %v897_v62 }
  0xa9   :  { %817 = vmatprep.subr.bf16.mxu0 %v944_v38  ;;  %834 = vmatpush3.bf16.msra.mxu1 %v904_v7 }
  0xaa   :  { %835 = vmatprep.subr.bf16.mxu1 %v944_v38 }
  0xac   :  { %818 = vmatpush3.bf16.msra.mxu0 %v898_v63 }
  0xad   :  { %819 = vmatprep.subr.bf16.mxu0 %v944_v38  ;;  %836 = vmatpush3.bf16.msra.mxu1 %v905_v8 }
  0xae   :  { %837 = vmatprep.subr.bf16.mxu1 %v944_v38 }
  0xb0   :  { %820 = vmatpush3.bf16.msra.mxu0 %v899_v0 }
  0xb1   :  { %821 = vmatprep.subr.bf16.mxu0 %v944_v38  ;;  %838 = vmatpush3.bf16.msra.mxu1 %v906_v9 }
  0xb2   :  { %839 = vmatprep.subr.bf16.mxu1 %v944_v38 }
  0xb4   :  { %822 = vmatpush3.bf16.msra.mxu0 %v900_v1 }
  0xb5   :  { %840 = vmatpush3.bf16.msra.mxu1 %v907_v10 }
  0xb6   :  { %841 = vmatprep.subr.bf16.mxu1 %v944_v38 }
  0xb7   :  { %824 = vmatmul.mubr.bf16.vlgmr.msra.gmra.mrb[4].mxu0 %v103_v3 }
  0xb9   :  { %842 = vmatpush3.bf16.msra.mxu1 %v908_v11 }
 0x16a   :  { %v761_v12 = vpop.f32.mrb[0].mxu0 }
 0x16b   :  { %v762_v14 = vpop.f32.mrb[1].mxu0 }
 0x16c   :  { %v763_v15 = vadd.f32 %v762_v14, %v761_v12  ;;  %v764_v16 = vpop.f32.mrb[2].mxu0 }
 0x16d   :  { %v765_v17 = vpop.f32.mrb[3].mxu0 }
 0x16e   :  { %v783_v18 = vpop.f32.mrb[0].mxu1  ;;  %v466_v19 = vadd.f32 %v763_v15, %v695_v13 }
 0x16f   :  { %v784_v20 = vpop.f32.mrb[1].mxu1 }
 0x170   :  { %v785_v21 = vadd.f32 %v784_v20, %v783_v18  ;;  %v786_v22 = vpop.f32.mrb[2].mxu1 }
 0x171   :  { %v787_v23 = vpop.f32.mrb[3].mxu1 }
 0x172   :  { %v506_v24 = vadd.f32 %v785_v21, %v466_v19 }
 0x18a   :  { %v545_v25 = vpop.f32.mrb[4].mxu0 }
 0x18b   :  { %v546_v26 = vadd.f32 %v545_v25, %v506_v24  ;;  %v825_v27 = vpop.f32.mrb[5].mxu0 }
 0x18c   :  { %v548_v28 = vpop.f32.mrb[6].mxu0 }
 0x18d   :  { %909 = vtanh.f32 %v546_v26  ;;  %v826_v29 = vpop.f32.mrb[7].mxu0 }
 0x197   :  { %v910_v30 = vpop.eup %909 }
 0x198   :  { %v552_v31 = vpack.c.bf16 %v910_v30, %v910_v30 }
 0x19a   :  { %844 = vmatmul.mubr.bf16.vlgmr.msra.gmra.mrb[4].mxu1 %v552_v31 }
 0x26d   :  { %v658_v33 = vpop.f32.mrb[4].mxu1 }
 0x26e   :  { %v659_v34 = vadd.f32 %v736_v32, %v658_v33  ;;  %v845_v35 = vpop.f32.mrb[5].mxu1 }
 0x26f   :  { %v661_v36 = vpop.f32.mrb[6].mxu1 }
 0x270   :  { %664 = vmax.xlane.f32.xlu0 %v659_v34  ;;  %v846_v37 = vpop.f32.mrb[7].mxu1 }
 0x2fd   :  { %v665_v38 = vpop.xlane.xlu0 %664 }
 0x2fe   :  { %v666_v39 = vsub.f32 %v659_v34, %v665_v38 }
 0x300   :  { %v667_v40 = vmul.f32 1.442695, %v666_v39 }
 0x302   :  { %911 = vpow2.f32 %v667_v40 }
 0x30c   :  { %v912_v41 = vpop.eup %911 }
 0x30d   :  { %669 = vadd.xlane.f32.xlu1 %v912_v41 }
 0x39a   :  { %v670_v42 = vpop.xlane.xlu1 %669 }
 0x39b   :  { %913 = vlog2.f32 %v670_v42 }
 0x3a5   :  { %v914_v43 = vpop.eup %913 }
 0x3a6   :  { %v672_v44 = vmul.f32 0.6931472, %v914_v43 }
 0x3a8   :  { %v673_v45 = vsub.f32 %v666_v39, %v672_v44 }
 0x3aa   :  { %675 = vst.msk [vmem:[#allocation2] sm:$0xff] %vm674_vm14, %v673_v45 }
 0x3ab   :  { %926 = shalt.err (!%p923_p4)
}
 0x3ac   :  { %s927_s17 = scalar_lea.hbm %s1216_s5, 128 }
 0x3ad   :  { %p928_p5 = scmp.ne.s32.totalorder %s1216_s5, %s927_s17  ;;  %p931_p6 = scmp.lt.u32.totalorder %s927_s17, %s1216_s5 }
 0x3af   :  { %p933_p7 = pnand %p931_p6, %p928_p5 }
 0x3b1   :  { %936 = shalt.err (!%p933_p7)
}
 0x3b2   :  { %685 = dma.vmem_to_hbm [thread:$0]  %s683_s14, 128, %s1216_s5, [#allocation3]  }
 0x3b3   :  { %937 = dma.done.wait [#allocation3], 128  }
 0x3b4   :  { %938 = vsyncadd [#allocation3], 4294967168 }
 0x3b5   :  { %689 = vsyncpa [#allocation3], 1 }

</bundles_post_ra>
